<compile_context>
chip_gen: v6e
topology: v6e:2x2x1
jax: 0.10.0
libtpu: 0.0.40
codegen_flags: <defaults>
</compile_context>

<pallas_src>
import jax
import jax.numpy as jnp
from jax.experimental import pallas as pl
from jax.experimental.pallas import tpu as pltpu


def _sobel_kernel(x_ref, out_ref, pad_ref):
    """Separable 3x3 Sobel on a (TB, 1, H, W) tile.

    x_ref:   VMEM (TB, 1, H, W)   input tile.
    out_ref: VMEM (TB, 2, H, W)   output tile -> [Ix, Iy].
    pad_ref: VMEM (TB, H+2, W+2)  scratch holding the zero-haloed tile.
    """
    _, _, H, W = x_ref.shape

    # Build the zero halo in VMEM (implements padding_mode='zeros') with no
    # extra HBM traffic. Zero the whole scratch every step so correctness does
    # not depend on how the parallel grid axis is sharded across TensorCores.
    pad_ref[...] = jnp.zeros_like(pad_ref)
    pad_ref[:, 1:H + 1, 1:W + 1] = x_ref[:, 0, :, :]
    xp = pad_ref[...]                                    # (TB, H+2, W+2)

    # Vertical passes (weights folded in as constants).
    ty = xp[:, 0:H, :] + 2.0 * xp[:, 1:H + 1, :] + xp[:, 2:H + 2, :]   # [1,2,1]
    dy = xp[:, 2:H + 2, :] - xp[:, 0:H, :]                             # [-1,0,1]

    # Horizontal passes -> lane-dense (last dim = W) output stores.
    out_ref[:, 0, :, :] = ty[:, :, 2:W + 2] - ty[:, :, 0:W]            # Ix
    out_ref[:, 1, :, :] = (dy[:, :, 0:W] + 2.0 * dy[:, :, 1:W + 1]
                           + dy[:, :, 2:W + 2])                        # Iy


def image_gradients(x: jnp.ndarray) -> jnp.ndarray:
    """x: (N, 1, H, W) -> (N, 2, H, W) float32 (Ix, Iy)."""
    N, C, H, W = x.shape
    assert C == 1, "ImageGradientsLayer expects single-channel input"
    x = x.astype(jnp.float32)

    # Batch tile: largest divisor of N whose per-step working set
    # (input + 2-channel output + halo scratch, double-buffered) stays at a
    # few MB -> amortizes per-step overhead on small images and stays inside
    # the smallest (v5e/v7x) scoped-VMEM defaults on large ones.
    # Note: for very large single images one could additionally tile H with a
    # 2-row halo; whole-(H, W) blocks are kept here for simplicity.
    bytes_per_image = 4 * (H * W + 2 * H * W + (H + 2) * (W + 2))
    tb_cap = max(1, min(N, (4 << 20) // max(1, 2 * bytes_per_image)))
    tb = 1
    for d in range(1, tb_cap + 1):
        if N % d == 0:
            tb = d

    out = pl.pallas_call(
        _sobel_kernel,
        out_shape=jax.ShapeDtypeStruct((N, 2, H, W), jnp.float32),
        grid=(N // tb,),
        in_specs=[pl.BlockSpec((tb, 1, H, W), lambda b: (b, 0, 0, 0))],
        out_specs=pl.BlockSpec((tb, 2, H, W), lambda b: (b, 0, 0, 0)),
        scratch_shapes=[pltpu.VMEM((tb, H + 2, W + 2), jnp.float32)],
        compiler_params=pltpu.CompilerParams(
            dimension_semantics=("parallel",)),
    )(x)
    return out


def get_sobel_xy_parameters() -> jnp.ndarray:
    """Deterministic Sobel weights, shape (2, 1, 3, 3): [sobel_x, sobel_y]."""
    sobel_x = jnp.array([[-1., 0., 1.],
                         [-2., 0., 2.],
                         [-1., 0., 1.]], dtype=jnp.float32)
    sobel_y = jnp.array([[-1., -2., -1.],
                         [0., 0., 0.],
                         [1., 2., 1.]], dtype=jnp.float32)
    return jnp.stack([sobel_x, sobel_y])[:, None, :, :]


def _reference(x: jnp.ndarray) -> jnp.ndarray:
    """Pure-JAX reference (lax conv) for correctness checking."""
    w = get_sobel_xy_parameters()  # (2, 1, 3, 3) OIHW
    return jax.lax.conv_general_dilated(
        x.astype(jnp.float32), w, window_strides=(1, 1),
        padding=((1, 1), (1, 1)),
        dimension_numbers=("NCHW", "OIHW", "NCHW"))


if __name__ == "__main__":
    key = jax.random.PRNGKey(0)
    x = jax.random.normal(key, (2, 1, 16, 16), dtype=jnp.float32)

    out = jax.block_until_ready(image_gradients(x))

    ref = _reference(x)
    assert out.shape == (2, 2, 16, 16), out.shape
    assert jnp.allclose(out, ref, atol=1e-5, rtol=1e-5), (
        float(jnp.max(jnp.abs(out - ref))))
    print("KERNEL_OK")
</pallas_src>

<mosaic_0001>
module attributes {stable_mosaic.version = 11 : i64} {
  func.func @_sobel_kernel(%arg0: i32, %arg1: memref<2x1x16x16xf32, #tpu.memory_space<vmem>>, %arg2: memref<2x2x16x16xf32, #tpu.memory_space<vmem>>, %arg3: memref<2x18x18xf32, #tpu.memory_space<vmem>>) attributes {dimension_semantics = [#tpu.dimension_semantics<parallel>], iteration_bounds = array<i64: 1>, scalar_prefetch = 0 : i64, scratch_operands = 1 : i64, tpu.core_type = #tpu.core_type<tc>, window_params = [{transform_indices = @transform_0, window_bounds = array<i64: 2, 1, 16, 16>}, {transform_indices = @transform_1, window_bounds = array<i64: 2, 2, 16, 16>}]} {
    %cst = arith.constant 0.000000e+00 : f32
    %0 = vector.broadcast %cst : f32 to vector<2x18x18xf32>
    %c0 = arith.constant 0 : index
    %c0_0 = arith.constant 0 : index
    %c0_1 = arith.constant 0 : index
    %1 = vector.load %arg3[%c0, %c0_0, %c0_1] : memref<2x18x18xf32, #tpu.memory_space<vmem>>, vector<2x18x18xf32>
    tpu.vector_store %arg3[%c0, %c0_0, %c0_1], %0 {strides = array<i32>} : memref<2x18x18xf32, #tpu.memory_space<vmem>>, vector<2x18x18xf32>,
    %c0_2 = arith.constant 0 : index
    %c0_3 = arith.constant 0 : index
    %c0_4 = arith.constant 0 : index
    %c0_5 = arith.constant 0 : index
    %2 = vector.load %arg1[%c0_2, %c0_3, %c0_4, %c0_5] : memref<2x1x16x16xf32, #tpu.memory_space<vmem>>, vector<2x1x16x16xf32>
    %3 = vector.shape_cast %2 : vector<2x1x16x16xf32> to vector<2x16x16xf32>
    %c0_6 = arith.constant 0 : index
    %c1 = arith.constant 1 : index
    %c1_7 = arith.constant 1 : index
    %4 = vector.load %arg3[%c0_6, %c1, %c1_7] : memref<2x18x18xf32, #tpu.memory_space<vmem>>, vector<2x16x16xf32>
    tpu.vector_store %arg3[%c0_6, %c1, %c1_7], %3 {strides = array<i32>} : memref<2x18x18xf32, #tpu.memory_space<vmem>>, vector<2x16x16xf32>,
    %c0_8 = arith.constant 0 : index
    %c0_9 = arith.constant 0 : index
    %c0_10 = arith.constant 0 : index
    %5 = vector.load %arg3[%c0_8, %c0_9, %c0_10] : memref<2x18x18xf32, #tpu.memory_space<vmem>>, vector<2x18x18xf32>
    %6 = vector.extract_strided_slice %5 {offsets = [0, 0, 0], sizes = [2, 16, 18], strides = [1, 1, 1]} : vector<2x18x18xf32> to vector<2x16x18xf32>
    %7 = vector.extract_strided_slice %5 {offsets = [0, 1, 0], sizes = [2, 16, 18], strides = [1, 1, 1]} : vector<2x18x18xf32> to vector<2x16x18xf32>
    %cst_11 = arith.constant 2.000000e+00 : f32
    %8 = vector.broadcast %cst_11 : f32 to vector<2x16x18xf32>
    %9 = arith.mulf %8, %7 : vector<2x16x18xf32>
    %10 = arith.addf %6, %9 : vector<2x16x18xf32>
    %11 = vector.extract_strided_slice %5 {offsets = [0, 2, 0], sizes = [2, 16, 18], strides = [1, 1, 1]} : vector<2x18x18xf32> to vector<2x16x18xf32>
    %12 = arith.addf %10, %11 : vector<2x16x18xf32>
    %13 = vector.extract_strided_slice %5 {offsets = [0, 2, 0], sizes = [2, 16, 18], strides = [1, 1, 1]} : vector<2x18x18xf32> to vector<2x16x18xf32>
    %14 = vector.extract_strided_slice %5 {offsets = [0, 0, 0], sizes = [2, 16, 18], strides = [1, 1, 1]} : vector<2x18x18xf32> to vector<2x16x18xf32>
    %15 = arith.subf %13, %14 : vector<2x16x18xf32>
    %16 = vector.extract_strided_slice %12 {offsets = [0, 0, 2], sizes = [2, 16, 16], strides = [1, 1, 1]} : vector<2x16x18xf32> to vector<2x16x16xf32>
    %17 = vector.extract_strided_slice %12 {offsets = [0, 0, 0], sizes = [2, 16, 16], strides = [1, 1, 1]} : vector<2x16x18xf32> to vector<2x16x16xf32>
    %18 = arith.subf %16, %17 : vector<2x16x16xf32>
    %c0_12 = arith.constant 0 : index
    %c0_13 = arith.constant 0 : index
    %c0_14 = arith.constant 0 : index
    %c0_15 = arith.constant 0 : index
    %19 = vector.load %arg2[%c0_12, %c0_13, %c0_14, %c0_15] : memref<2x2x16x16xf32, #tpu.memory_space<vmem>>, vector<2x1x16x16xf32>
    %20 = vector.shape_cast %19 : vector<2x1x16x16xf32> to vector<2x16x16xf32>
    %21 = vector.shape_cast %18 : vector<2x16x16xf32> to vector<2x1x16x16xf32>
    tpu.vector_store %arg2[%c0_12, %c0_13, %c0_14, %c0_15], %21 {strides = array<i32>} : memref<2x2x16x16xf32, #tpu.memory_space<vmem>>, vector<2x1x16x16xf32>,
    %22 = vector.extract_strided_slice %15 {offsets = [0, 0, 0], sizes = [2, 16, 16], strides = [1, 1, 1]} : vector<2x16x18xf32> to vector<2x16x16xf32>
    %23 = vector.extract_strided_slice %15 {offsets = [0, 0, 1], sizes = [2, 16, 16], strides = [1, 1, 1]} : vector<2x16x18xf32> to vector<2x16x16xf32>
    %cst_16 = arith.constant 2.000000e+00 : f32
    %24 = vector.broadcast %cst_16 : f32 to vector<2x16x16xf32>
    %25 = arith.mulf %24, %23 : vector<2x16x16xf32>
    %26 = arith.addf %22, %25 : vector<2x16x16xf32>
    %27 = vector.extract_strided_slice %15 {offsets = [0, 0, 2], sizes = [2, 16, 16], strides = [1, 1, 1]} : vector<2x16x18xf32> to vector<2x16x16xf32>
    %28 = arith.addf %26, %27 : vector<2x16x16xf32>
    %c0_17 = arith.constant 0 : index
    %c1_18 = arith.constant 1 : index
    %c0_19 = arith.constant 0 : index
    %c0_20 = arith.constant 0 : index
    %29 = vector.load %arg2[%c0_17, %c1_18, %c0_19, %c0_20] : memref<2x2x16x16xf32, #tpu.memory_space<vmem>>, vector<2x1x16x16xf32>
    %30 = vector.shape_cast %29 : vector<2x1x16x16xf32> to vector<2x16x16xf32>
    %31 = vector.shape_cast %28 : vector<2x16x16xf32> to vector<2x1x16x16xf32>
    tpu.vector_store %arg2[%c0_17, %c1_18, %c0_19, %c0_20], %31 {strides = array<i32>} : memref<2x2x16x16xf32, #tpu.memory_space<vmem>>, vector<2x1x16x16xf32>,
    return
  }
  func.func @transform_0(%arg0: i32) -> (i32, i32, i32, i32) {
    %c0_i32 = arith.constant 0 : i32
    %c0_i32_0 = arith.constant 0 : i32
    %c0_i32_1 = arith.constant 0 : i32
    %c0_i32_2 = arith.constant 0 : i32
    return %arg0, %c0_i32, %c0_i32_0, %c0_i32_1 : i32, i32, i32, i32
  }
  func.func @transform_1(%arg0: i32) -> (i32, i32, i32, i32) {
    %c0_i32 = arith.constant 0 : i32
    %c0_i32_0 = arith.constant 0 : i32
    %c0_i32_1 = arith.constant 0 : i32
    %c0_i32_2 = arith.constant 0 : i32
    return %arg0, %c0_i32, %c0_i32_0, %c0_i32_1 : i32, i32, i32, i32
  }
}

</mosaic_0001>

<bundles_post_ra>
// kernel: tpu_custom_call.1
= control target key start
LH: loop header
LB: loop body
LE: loop exit
PB: predicated region body
PF: predicated region fallthrough
CT: control target
= control target key end

     0   :  { %6 = vsyncpa [#allocation4], 0  ;;  %s370_s0 = inlined_call_operand.hbm [shape: f32[2,1,16,16], index: 0, kind: input, shape index: {}]   ;;  %s371_s1 = inlined_call_operand.hbm [shape: f32[2,2,16,16], index: 1, kind: output, shape index: {}]  }
   0x1   :  { %7 = vsyncpa [#allocation5], 0  ;;  %s323_s6 = smov [#allocation3]  }
   0x2   :  { %s13_s7 = sshll.u32 %s323_s6, 4  ;;  %s14_s7 = int_to_ptr.vmem [resolvable:$true] %s13_s7 }
   0x3   :  { %s287_s8 = scalar_lea.vmem %s14_s7, 512  ;;  %p292_p1 = scmp.lt.s32.totalorder %s14_s7, %s14_s7 }
   0x4   :  { %p288_p0 = scmp.ne.s32.totalorder %s14_s7, %s287_s8  ;;  %p293_p2 = scmp.lt.s32.totalorder %s287_s8, %s287_s8 }
   0x6   :  { %p294_p3 = por %p293_p2, %p292_p1 }
   0x8   :  { %p295_p4 = pnand %p294_p3, %p288_p0 }
   0xa   :  { %298 = shalt.err (!%p295_p4)
}
   0xb   :  { %s324_s9 = smov 128   ;;  %s325_s10 = smov 8  }
   0xc   :  { %19 = dma.hbm_to_vmem [thread:$0]  %s370_s0, 512, %s14_s7, [#allocation4], %s324_s9, %s324_s9, %s325_s10  }
   0xd   :  { %319 = dma.done.wait [#allocation4], 512  }
   0xe   :  { %320 = vsyncadd [#allocation4], 4294966784  ;;  %vm23_vm0 = vcmask 146432   ;;  %v326_v0 = vmov 0.0   ;;  %vm26_vm1 = vcmask 140288   ;;  %v33_v1 = vld [vmem:[#allocation3 + $0x10] sm:$0xff] }
   0xf   :  { %28 = vst.msk [vmem:[#allocation2 + $0x18] sm:$0xff] %vm23_vm0, %v326_v0  ;;  %29 = vst.msk [vmem:[#allocation2 + $0x20] sm:$0xff] %vm23_vm0, %v326_v0  ;;  %v31_v2 = vld [vmem:[#allocation3] sm:$0xff]  ;;  %s327_s13 = smov 1   ;;  %v34_v3 = vld [vmem:[#allocation3 + $0x18] sm:$0xff]  ;;  %vm51_vm2 = vcmask 138248  }
  0x10   :  { %24 = vst.msk [vmem:[#allocation2] sm:$0xff] %vm23_vm0, %v326_v0  ;;  %25 = vst.msk [vmem:[#allocation2 + $0x8] sm:$0xff] %vm23_vm0, %v326_v0  ;;  %43 = vrot.lane.b32.xlu1 %v33_v1, %s327_s13  ;;  %39 = vrot.lane.b32.xlu0 %v31_v2, %s327_s13  ;;  %v32_v4 = vld [vmem:[#allocation3 + $0x8] sm:$0xff]  ;;  %vm74_vm3 = vcmask 1046528   ;;  %vm99_vm4 = vcmask 1045504   ;;  %vm118_vm5 = vcmask 1041408  }
  0x11   :  { %30 = vst.msk [vmem:[#allocation2 + $0x28] sm:$0x3] %vm26_vm1, %v326_v0  ;;  %27 = vst.msk [vmem:[#allocation2 + $0x10] sm:$0x3] %vm26_vm1, %v326_v0  ;;  %s328_s0 = smov 2   ;;  %s329_s14 = smov 127  }
  0x12   :  { %s330_s15 = smov 126   ;;  %vm173_vm6 = vcmask 130048   ;;  %vm245_vm7 = vcmask 130050   ;;  %vm248_vm8 = vcmask 123904   ;;  %s331_s16 = smov [#allocation6]  }
  0x13   :  { %s258_s17 = sshll.u32 %s331_s16, 4  ;;  %s259_s17 = int_to_ptr.vmem [resolvable:$true] %s258_s17 }
  0x14   :  { %45 = vrot.lane.b32.xlu1 %v34_v3, %s327_s13  ;;  %41 = vrot.lane.b32.xlu0 %v32_v4, %s327_s13  ;;  %s299_s18 = scalar_lea.vmem %s259_s17, 1024  ;;  %p304_p6 = scmp.lt.s32.totalorder %s259_s17, %s259_s17 }
  0x15   :  { %p300_p5 = scmp.ne.s32.totalorder %s259_s17, %s299_s18  ;;  %p305_p7 = scmp.lt.s32.totalorder %s299_s18, %s299_s18 }
  0x17   :  { %p306_p8 = por %p305_p7, %p304_p6 }
  0x19   :  { %p307_p9 = pnand %p306_p8, %p300_p5 }
  0x82   :  { %v44_v5 = vpop.permute.xlu1 %43  ;;  %v40_v6 = vpop.permute.xlu0 %39 }
  0x83   :  { %54 = vst.msk [vmem:[#allocation2 + $0x19] sm:$0xff] %vm51_vm2, %v44_v5  ;;  %52 = vst.msk [vmem:[#allocation2 + $0x1] sm:$0xff] %vm51_vm2, %v40_v6 }
  0x86   :  { %v46_v7 = vpop.permute.xlu1 %45  ;;  %v42_v8 = vpop.permute.xlu0 %41 }
  0x87   :  { %55 = vst.msk [vmem:[#allocation2 + $0x21] sm:$0xff] %vm51_vm2, %v46_v7  ;;  %53 = vst.msk [vmem:[#allocation2 + $0x9] sm:$0xff] %vm51_vm2, %v42_v8 }
  0x8a   :  { %v56_v9 = vld [vmem:[#allocation2] sm:$0xff]  ;;  %v59_v10 = vld [vmem:[#allocation2 + $0x18] sm:$0xff] }
  0x8b   :  { %v62_v11 = vmul.f32 2.0, %v56_v9  ;;  %v65_v12 = vmul.f32 2.0, %v59_v10  ;;  %v100_v27 = vrot.slane %v56_v9, 2  ;;  %v105_v30 = vrot.slane %v59_v10, 2 }
  0x8c   :  { %v119_v33 = vrot.slane %v56_v9, 6  ;;  %v122_v50 = vrot.slane %v59_v10, 6 }
  0x8d   :  { %v75_v19 = vrot.slane %v62_v11, 1  ;;  %v80_v22 = vrot.slane %v65_v12, 1 }
  0x8e   :  { %v57_v13 = vld [vmem:[#allocation2 + $0x8] sm:$0xff]  ;;  %v58_v14 = vld [vmem:[#allocation2 + $0x10] sm:$0x3]  ;;  %v60_v15 = vld [vmem:[#allocation2 + $0x20] sm:$0xff]  ;;  %v131_v54 = vsub.f32 %v56_v9, %v119_v33  ;;  %v134_v58 = vsub.f32 %v59_v10, %v122_v50 }
  0x8f   :  { %v63_v16 = vmul.f32 2.0, %v57_v13  ;;  %v64_v17 = vmul.f32 2.0, %v58_v14  ;;  %v61_v18 = vld [vmem:[#allocation2 + $0x28] sm:$0x3]  ;;  %v66_v20 = vmul.f32 2.0, %v60_v15  ;;  %v101_v25 = vrot.slane %v57_v13, 2 }
  0x90   :  { %v67_v21 = vmul.f32 2.0, %v61_v18  ;;  %v103_v26 = vrot.slane %v58_v14, 2  ;;  %v120_v34 = vrot.slane %v57_v13, 6  ;;  %v106_v41 = vrot.slane %v60_v15, 2 }
  0x91   :  { %v76_v23 = vrot.slane %v63_v16, 1  ;;  %v78_v24 = vrot.slane %v64_v17, 1  ;;  %v81_v28 = vrot.slane %v66_v20, 1  ;;  %v102_v40 = vsel %vm99_vm4, %v100_v27, %v101_v25 }
  0x92   :  { %v83_v29 = vrot.slane %v67_v21, 1  ;;  %v104_v39 = vsel %vm99_vm4, %v101_v25, %v103_v26  ;;  %v108_v42 = vrot.slane %v61_v18, 2  ;;  %v121_v47 = vsel %vm118_vm5, %v119_v33, %v120_v34 }
  0x93   :  { %v79_v31 = vsel %vm74_vm3, %v76_v23, %v78_v24  ;;  %v77_v32 = vsel %vm74_vm3, %v75_v19, %v76_v23  ;;  %v82_v38 = vsel %vm74_vm3, %v80_v22, %v81_v28  ;;  %v107_v49 = vsel %vm99_vm4, %v105_v30, %v106_v41 }
  0x94   :  { %v90_v35 = vadd.f32 %v79_v31, %v57_v13  ;;  %v89_v36 = vadd.f32 %v77_v32, %v56_v9  ;;  %v84_v37 = vsel %vm74_vm3, %v81_v28, %v83_v29  ;;  %v91_v46 = vadd.f32 %v82_v38, %v59_v10 }
  0x95   :  { %v92_v45 = vadd.f32 %v84_v37, %v60_v15  ;;  %v109_v48 = vsel %vm99_vm4, %v106_v41, %v108_v42  ;;  %v132_v53 = vsub.f32 %v57_v13, %v121_v47  ;;  %v123_v55 = vrot.slane %v60_v15, 6 }
  0x96   :  { %v115_v43 = vadd.f32 %v104_v39, %v90_v35  ;;  %v114_v44 = vadd.f32 %v102_v40, %v89_v36  ;;  %v116_v52 = vadd.f32 %v107_v49, %v91_v46  ;;  %v178_v57 = vmul.f32 2.0, %v131_v54 }
  0x97   :  { %v117_v51 = vadd.f32 %v109_v48, %v92_v45  ;;  %v179_v56 = vmul.f32 2.0, %v132_v53  ;;  %v133_v59 = vsub.f32 %v58_v14, %v120_v34  ;;  %v124_v60 = vsel %vm118_vm5, %v122_v50, %v123_v55 }
  0x98   :  { %143 = vrot.lane.b32.xlu1 %v115_v43, %s328_s0  ;;  %141 = vrot.lane.b32.xlu0 %v114_v44, %s328_s0  ;;  %v181_v61 = vmul.f32 2.0, %v134_v58  ;;  %v136_v63 = vsub.f32 %v61_v18, %v123_v55  ;;  %v135_v0 = vsub.f32 %v60_v15, %v124_v60 }
  0x99   :  { %v180_v62 = vmul.f32 2.0, %v133_v59 }
  0x9a   :  { %v183_v1 = vmul.f32 2.0, %v136_v63  ;;  %v182_v2 = vmul.f32 2.0, %v135_v0 }
  0x9c   :  { %147 = vrot.lane.b32.xlu1 %v117_v51, %s328_s0  ;;  %145 = vrot.lane.b32.xlu0 %v116_v52, %s328_s0 }
  0xa0   :  { %192 = vrot.lane.b32.xlu1 %v179_v56, %s329_s14  ;;  %190 = vrot.lane.b32.xlu0 %v178_v57, %s329_s14 }
  0xa4   :  { %196 = vrot.lane.b32.xlu1 %v181_v61, %s329_s14  ;;  %194 = vrot.lane.b32.xlu0 %v180_v62, %s329_s14 }
  0xa8   :  { %200 = vrot.lane.b32.xlu1 %v183_v1, %s329_s14  ;;  %198 = vrot.lane.b32.xlu0 %v182_v2, %s329_s14 }
  0xac   :  { %222 = vrot.lane.b32.xlu1 %v132_v53, %s330_s15  ;;  %220 = vrot.lane.b32.xlu0 %v131_v54, %s330_s15 }
  0xb0   :  { %226 = vrot.lane.b32.xlu1 %v134_v58, %s330_s15  ;;  %224 = vrot.lane.b32.xlu0 %v133_v59, %s330_s15 }
  0xb4   :  { %230 = vrot.lane.b32.xlu1 %v136_v63, %s330_s15  ;;  %228 = vrot.lane.b32.xlu0 %v135_v0, %s330_s15 }
 0x10a   :  { %v144_v3 = vpop.permute.xlu1 %143  ;;  %v142_v4 = vpop.permute.xlu0 %141 }
 0x10b   :  { %v154_v5 = vsub.f32 %v115_v43, %v144_v3  ;;  %v153_v6 = vsub.f32 %v114_v44, %v142_v4 }
 0x10d   :  { %163 = vrot.lane.b32.xlu1 %v154_v5, %s330_s15  ;;  %161 = vrot.lane.b32.xlu0 %v153_v6, %s330_s15 }
 0x10e   :  { %v148_v7 = vpop.permute.xlu1 %147  ;;  %v146_v8 = vpop.permute.xlu0 %145 }
 0x10f   :  { %v156_v9 = vsub.f32 %v117_v51, %v148_v7  ;;  %v155_v10 = vsub.f32 %v116_v52, %v146_v8 }
 0x111   :  { %167 = vrot.lane.b32.xlu1 %v156_v9, %s330_s15  ;;  %165 = vrot.lane.b32.xlu0 %v155_v10, %s330_s15 }
 0x112   :  { %v193_v11 = vpop.permute.xlu1 %192  ;;  %v191_v12 = vpop.permute.xlu0 %190 }
 0x113   :  { %v209_v17 = vadd.f32 %v193_v11, %v132_v53  ;;  %v208_v18 = vadd.f32 %v191_v12, %v131_v54 }
 0x116   :  { %v197_v13 = vpop.permute.xlu1 %196  ;;  %v195_v14 = vpop.permute.xlu0 %194 }
 0x117   :  { %v211_v23 = vadd.f32 %v197_v13, %v134_v58  ;;  %v210_v24 = vadd.f32 %v195_v14, %v133_v59 }
 0x11a   :  { %v201_v15 = vpop.permute.xlu1 %200  ;;  %v199_v16 = vpop.permute.xlu0 %198 }
 0x11b   :  { %v213_v29 = vadd.f32 %v201_v15, %v136_v63  ;;  %v212_v30 = vadd.f32 %v199_v16, %v135_v0 }
 0x11e   :  { %v223_v19 = vpop.permute.xlu1 %222  ;;  %v221_v20 = vpop.permute.xlu0 %220 }
 0x11f   :  { %v239_v21 = vadd.f32 %v223_v19, %v209_v17  ;;  %v238_v22 = vadd.f32 %v221_v20, %v208_v18 }
 0x121   :  { %247 = vst.msk [vmem:[#allocation6 + $0x16] sm:$0xff] %vm173_vm6, %v239_v21 }
 0x122   :  { %246 = vst.msk [vmem:[#allocation6 + $0xe] sm:$0xfc] %vm245_vm7, %v238_v22  ;;  %v227_v25 = vpop.permute.xlu1 %226  ;;  %v225_v26 = vpop.permute.xlu0 %224 }
 0x123   :  { %v241_v27 = vadd.f32 %v227_v25, %v211_v23  ;;  %v240_v28 = vadd.f32 %v225_v26, %v210_v24 }
 0x125   :  { %250 = vst.msk [vmem:[#allocation6 + $0x2e] sm:$0xfc] %vm245_vm7, %v241_v27 }
 0x126   :  { %249 = vst.msk [vmem:[#allocation6 + $0x1e] sm:$0x3] %vm248_vm8, %v240_v28  ;;  %v231_v31 = vpop.permute.xlu1 %230  ;;  %v229_v32 = vpop.permute.xlu0 %228 }
 0x127   :  { %v243_v33 = vadd.f32 %v231_v31, %v213_v29  ;;  %v242_v34 = vadd.f32 %v229_v32, %v212_v30 }
 0x129   :  { %252 = vst.msk [vmem:[#allocation6 + $0x3e] sm:$0x3] %vm248_vm8, %v243_v33 }
 0x12a   :  { %251 = vst.msk [vmem:[#allocation6 + $0x36] sm:$0xff] %vm173_vm6, %v242_v34 }
 0x17f   :  { %v164_v35 = vpop.permute.xlu1 %163  ;;  %v162_v36 = vpop.permute.xlu0 %161 }
 0x180   :  { %175 = vst.msk [vmem:[#allocation6 + $0x8] sm:$0xff] %vm173_vm6, %v164_v35  ;;  %174 = vst.msk [vmem:[#allocation6] sm:$0xff] %vm173_vm6, %v162_v36 }
 0x183   :  { %v168_v37 = vpop.permute.xlu1 %167  ;;  %v166_v38 = vpop.permute.xlu0 %165 }
 0x184   :  { %177 = vst.msk [vmem:[#allocation6 + $0x28] sm:$0xff] %vm173_vm6, %v168_v37  ;;  %176 = vst.msk [vmem:[#allocation6 + $0x20] sm:$0xff] %vm173_vm6, %v166_v38 }
 0x185   :  { %310 = shalt.err (!%p307_p9)
}
 0x186   :  { %264 = dma.vmem_to_hbm [thread:$0]  %s259_s17, 1024, %s371_s1, [#allocation5], %s324_s9, %s324_s9, %s325_s10  }
 0x187   :  { %321 = dma.done.wait [#allocation5], 1024  }
 0x188   :  { %322 = vsyncadd [#allocation5], 4294966272 }
 0x189   :  { %268 = vsyncpa [#allocation4], 1 }
 0x18a   :  { %269 = vsyncpa [#allocation5], 1 }

</bundles_post_ra>
